<compile_context>
chip_gen: v7x
topology: tpu7x:2x2x1
jax: 0.10.0
libtpu: 0.0.40
codegen_flags: <defaults>
</compile_context>

<pallas_src>
import functools

import jax
import jax.numpy as jnp
import numpy as np
from jax.experimental import pallas as pl
from jax.experimental.pallas import tpu as pltpu


# ---------------------------------------------------------------------------
# Phase 1: lane-dense channel pooling (mean + max over C), C tiled in the grid.
# ---------------------------------------------------------------------------
def _channel_pool_kernel(x_ref, pooled_ref, sum_ref, max_ref, *, C, tc):
    # x_ref:      VMEM (tc, HW)  one channel-chunk of one image (input dtype)
    # pooled_ref: VMEM (2, HW)   f32 [mean, max], written at the last c step
    # sum_ref:    VMEM (1, HW)   f32 running sum
    # max_ref:    VMEM (1, HW)   f32 running max
    c_idx = pl.program_id(1)

    @pl.when(c_idx == 0)
    def _init():
        sum_ref[...] = jnp.zeros_like(sum_ref)
        max_ref[...] = jnp.full_like(max_ref, -jnp.inf)

    xs = x_ref[...].astype(jnp.float32)          # per-chunk upcast only
    if C % tc != 0:
        # Ragged last chunk: mask padded channels out of both sum and max.
        hw = xs.shape[1]
        ch = c_idx * tc + jax.lax.broadcasted_iota(jnp.int32, (tc, hw), 0)
        valid = ch < C
        xs_sum = jnp.where(valid, xs, 0.0)
        xs_max = jnp.where(valid, xs, -jnp.inf)
    else:
        xs_sum, xs_max = xs, xs

    sum_ref[...] = sum_ref[...] + jnp.sum(xs_sum, axis=0, keepdims=True)
    max_ref[...] = jnp.maximum(max_ref[...],
                               jnp.max(xs_max, axis=0, keepdims=True))

    @pl.when(c_idx == pl.num_programs(1) - 1)
    def _finalize():
        pooled_ref[pl.ds(0, 1), :] = sum_ref[...] * (1.0 / C)   # mean = sum * 1/C
        pooled_ref[pl.ds(1, 1), :] = max_ref[...]


# ---------------------------------------------------------------------------
# Phase 2: 2 -> 1 channel KxK "same" conv (no bias) + sigmoid.
# ---------------------------------------------------------------------------
def _spatial_conv_kernel(w_ref, f_ref, o_ref, *, K, pad, H, W):
    # w_ref: SMEM (2*K*K,) f32 conv weights, order [cin, kh, kw]
    # f_ref: VMEM (2, H, W) f32 pooled [mean, max] maps
    # o_ref: VMEM (1, H, W) output (input dtype)
    Hp, Wp = H + 2 * pad, W + 2 * pad
    acc = jnp.zeros((H, W), jnp.float32)
    for ci in range(2):
        feat = f_ref[ci]                                        # (H, W)
        padded = jnp.zeros((Hp, Wp), jnp.float32)               # zero "same" pad
        padded = jax.lax.dynamic_update_slice(padded, feat, (pad, pad))
        for kw in range(K):
            # Hoist the lane-offset (kw) window out of the kh loop; the inner
            # taps are then lane-aligned sublane slices.
            col = jax.lax.slice(padded, (0, kw), (Hp, kw + W))  # (Hp, W)
            for kh in range(K):
                w = w_ref[ci * K * K + kh * K + kw]             # scalar (SMEM)
                acc = acc + w * jax.lax.slice(col, (kh, 0), (kh + H, W))
    o_ref[0] = jax.nn.sigmoid(acc).astype(o_ref.dtype)


def _pick_c_tile(C, HW, itemsize, target_block_bytes=2 * 1024 * 1024):
    """Channel-tile size: keep a double-buffered x block small enough for
    v7x's 64 MiB VMEM while giving the pipeline many steps to hide DMA."""
    tc = max(1, target_block_bytes // (HW * itemsize))
    if tc >= C:
        return C
    tc = max(8, (tc // 8) * 8)          # keep the sublane dim 8-aligned when tiled
    return min(tc, C)


def spatial_attention(x, weight, kernel_size=7, c_tile=None):
    """x: (N, C, H, W); weight: (1, 2, K, K) (nn.Conv2d(2, 1, K, bias=False))."""
    assert kernel_size in (3, 7), "kernel size must be 3 or 7"
    K = kernel_size
    pad = 3 if K == 7 else 1
    N, C, H, W = x.shape
    HW = H * W

    if c_tile is None:
        c_tile = _pick_c_tile(C, HW, jnp.dtype(x.dtype).itemsize)
    tc = int(c_tile)
    num_c = -(-C // tc)

    x_flat = x.reshape(N, C, HW)                      # lane-dense reduction layout
    w_flat = weight.reshape(-1).astype(jnp.float32)   # (2*K*K,)

    # Phase 1: channel mean/max pooling, lane-dense, C tiled as reduction axis.
    pooled = pl.pallas_call(
        functools.partial(_channel_pool_kernel, C=C, tc=tc),
        out_shape=jax.ShapeDtypeStruct((N, 2, HW), jnp.float32),
        grid=(N, num_c),
        in_specs=[pl.BlockSpec((None, tc, HW), lambda n, c: (n, c, 0))],
        out_specs=pl.BlockSpec((None, 2, HW), lambda n, c: (n, 0, 0)),
        scratch_shapes=[pltpu.VMEM((1, HW), jnp.float32),
                        pltpu.VMEM((1, HW), jnp.float32)],
        compiler_params=pltpu.CompilerParams(
            dimension_semantics=("parallel", "arbitrary")),
    )(x_flat)

    # Phase 2: tiny 2-channel KxK conv + sigmoid on the pooled 2-D maps.
    feats = pooled.reshape(N, 2, H, W)                # free reshape in the wrapper
    out = pl.pallas_call(
        functools.partial(_spatial_conv_kernel, K=K, pad=pad, H=H, W=W),
        out_shape=jax.ShapeDtypeStruct((N, 1, H, W), x.dtype),
        grid=(N,),
        in_specs=[pl.BlockSpec(memory_space=pltpu.MemorySpace.SMEM),
                  pl.BlockSpec((None, 2, H, W), lambda n: (n, 0, 0, 0))],
        out_specs=pl.BlockSpec((None, 1, H, W), lambda n: (n, 0, 0, 0)),
        compiler_params=pltpu.CompilerParams(dimension_semantics=("parallel",)),
    )(w_flat, feats)
    return out


def spatial_attention_reference(x, weight, kernel_size=7):
    pad = 3 if kernel_size == 7 else 1
    avg = jnp.mean(x, axis=1, keepdims=True)
    mx = jnp.max(x, axis=1, keepdims=True)
    cat = jnp.concatenate([avg, mx], axis=1)
    out = jax.lax.conv_general_dilated(
        cat, weight, window_strides=(1, 1),
        padding=((pad, pad), (pad, pad)),
        dimension_numbers=("NCHW", "OIHW", "NCHW"),
    )
    return jax.nn.sigmoid(out)


if __name__ == "__main__":
    key = jax.random.PRNGKey(0)
    kx, kw = jax.random.split(key)

    N, C, H, W, K = 2, 4, 16, 16, 7
    x = jax.random.normal(kx, (N, C, H, W), jnp.float32)

    # Deterministic conv weight init (kaiming-uniform-like, as nn.Conv2d default)
    fan_in = 2 * K * K
    bound = 1.0 / (fan_in ** 0.5)
    weight = jax.random.uniform(kw, (1, 2, K, K), jnp.float32, -bound, bound)

    out = spatial_attention(x, weight, kernel_size=K)
    jax.block_until_ready(out)

    assert out.shape == (N, 1, H, W), out.shape
    ref = spatial_attention_reference(x, weight, kernel_size=K)
    np.testing.assert_allclose(np.asarray(out), np.asarray(ref),
                               rtol=1e-5, atol=1e-5)
    print("KERNEL_OK")
</pallas_src>

<mosaic_0001>
module attributes {stable_mosaic.version = 11 : i64} {
  func.func @_channel_pool_kernel(%arg0: i32, %arg1: i32, %arg2: memref<1x4x256xf32, #tpu.memory_space<vmem>>, %arg3: memref<1x2x256xf32, #tpu.memory_space<vmem>>, %arg4: memref<1x256xf32, #tpu.memory_space<vmem>>, %arg5: memref<1x256xf32, #tpu.memory_space<vmem>>) attributes {dimension_semantics = [#tpu.dimension_semantics<parallel>, #tpu.dimension_semantics<arbitrary>], iteration_bounds = array<i64: 2, 1>, scalar_prefetch = 0 : i64, scratch_operands = 2 : i64, tpu.core_type = #tpu.core_type<tc>, window_params = [{transform_indices = @transform_0, window_bounds = array<i64: 1, 4, 256>}, {transform_indices = @transform_1, window_bounds = array<i64: 1, 2, 256>}]} {
    %c0_i32 = arith.constant 0 : i32
    %0 = arith.cmpi eq, %arg1, %c0_i32 : i32
    %1 = arith.extui %0 : i1 to i32
    %c0_i32_0 = arith.constant 0 : i32
    %2 = arith.cmpi ne, %1, %c0_i32_0 : i32
    scf.if %2 {
      %cst_14 = arith.constant 0.000000e+00 : f32
      %18 = vector.broadcast %cst_14 : f32 to vector<1x256xf32>
      %c0_15 = arith.constant 0 : index
      %c0_16 = arith.constant 0 : index
      %19 = vector.load %arg4[%c0_15, %c0_16] : memref<1x256xf32, #tpu.memory_space<vmem>>, vector<1x256xf32>
      tpu.vector_store %arg4[%c0_15, %c0_16], %18 {strides = array<i32>} : memref<1x256xf32, #tpu.memory_space<vmem>>, vector<1x256xf32>,
      %cst_17 = arith.constant 0xFF800000 : f32
      %20 = vector.broadcast %cst_17 : f32 to vector<1x256xf32>
      %c0_18 = arith.constant 0 : index
      %c0_19 = arith.constant 0 : index
      %21 = vector.load %arg5[%c0_18, %c0_19] : memref<1x256xf32, #tpu.memory_space<vmem>>, vector<1x256xf32>
      tpu.vector_store %arg5[%c0_18, %c0_19], %20 {strides = array<i32>} : memref<1x256xf32, #tpu.memory_space<vmem>>, vector<1x256xf32>,
    } else {
    }
    %c0 = arith.constant 0 : index
    %c0_1 = arith.constant 0 : index
    %c0_2 = arith.constant 0 : index
    %3 = vector.load %arg2[%c0, %c0_1, %c0_2] : memref<1x4x256xf32, #tpu.memory_space<vmem>>, vector<1x4x256xf32>
    %4 = vector.shape_cast %3 : vector<1x4x256xf32> to vector<4x256xf32>
    %c0_3 = arith.constant 0 : index
    %c0_4 = arith.constant 0 : index
    %5 = vector.load %arg4[%c0_3, %c0_4] : memref<1x256xf32, #tpu.memory_space<vmem>>, vector<1x256xf32>
    %cst = arith.constant dense<0.000000e+00> : vector<256xf32>
    %6 = vector.multi_reduction <add>, %4, %cst [0] : vector<4x256xf32> to vector<256xf32>
    %7 = vector.shape_cast %6 : vector<256xf32> to vector<1x256xf32>
    %8 = arith.addf %5, %7 : vector<1x256xf32>
    %c0_5 = arith.constant 0 : index
    %c0_6 = arith.constant 0 : index
    %9 = vector.load %arg4[%c0_5, %c0_6] : memref<1x256xf32, #tpu.memory_space<vmem>>, vector<1x256xf32>
    tpu.vector_store %arg4[%c0_5, %c0_6], %8 {strides = array<i32>} : memref<1x256xf32, #tpu.memory_space<vmem>>, vector<1x256xf32>,
    %c0_7 = arith.constant 0 : index
    %c0_8 = arith.constant 0 : index
    %10 = vector.load %arg5[%c0_7, %c0_8] : memref<1x256xf32, #tpu.memory_space<vmem>>, vector<1x256xf32>
    %cst_9 = arith.constant dense<0xFF800000> : vector<256xf32>
    %11 = vector.multi_reduction <maximumf>, %4, %cst_9 [0] : vector<4x256xf32> to vector<256xf32>
    %12 = vector.shape_cast %11 : vector<256xf32> to vector<1x256xf32>
    %13 = arith.maximumf %10, %12 : vector<1x256xf32>
    %c0_10 = arith.constant 0 : index
    %c0_11 = arith.constant 0 : index
    %14 = vector.load %arg5[%c0_10, %c0_11] : memref<1x256xf32, #tpu.memory_space<vmem>>, vector<1x256xf32>
    tpu.vector_store %arg5[%c0_10, %c0_11], %13 {strides = array<i32>} : memref<1x256xf32, #tpu.memory_space<vmem>>, vector<1x256xf32>,
    %c0_i32_12 = arith.constant 0 : i32
    %15 = arith.cmpi eq, %arg1, %c0_i32_12 : i32
    %16 = arith.extui %15 : i1 to i32
    %c0_i32_13 = arith.constant 0 : i32
    %17 = arith.cmpi ne, %16, %c0_i32_13 : i32
    scf.if %17 {
      %c0_14 = arith.constant 0 : index
      %c0_15 = arith.constant 0 : index
      %18 = vector.load %arg4[%c0_14, %c0_15] : memref<1x256xf32, #tpu.memory_space<vmem>>, vector<1x256xf32>
      %cst_16 = arith.constant 2.500000e-01 : f32
      %19 = vector.broadcast %cst_16 : f32 to vector<1x256xf32>
      %20 = arith.mulf %18, %19 : vector<1x256xf32>
      %c0_17 = arith.constant 0 : index
      %c0_18 = arith.constant 0 : index
      %c0_19 = arith.constant 0 : index
      %21 = vector.load %arg3[%c0_17, %c0_18, %c0_19] : memref<1x2x256xf32, #tpu.memory_space<vmem>>, vector<1x1x256xf32>
      %22 = vector.shape_cast %21 : vector<1x1x256xf32> to vector<1x256xf32>
      %23 = vector.shape_cast %20 : vector<1x256xf32> to vector<1x1x256xf32>
      tpu.vector_store %arg3[%c0_17, %c0_18, %c0_19], %23 {strides = array<i32>} : memref<1x2x256xf32, #tpu.memory_space<vmem>>, vector<1x1x256xf32>,
      %c0_20 = arith.constant 0 : index
      %c0_21 = arith.constant 0 : index
      %24 = vector.load %arg5[%c0_20, %c0_21] : memref<1x256xf32, #tpu.memory_space<vmem>>, vector<1x256xf32>
      %c0_22 = arith.constant 0 : index
      %c1 = arith.constant 1 : index
      %c0_23 = arith.constant 0 : index
      %25 = vector.load %arg3[%c0_22, %c1, %c0_23] : memref<1x2x256xf32, #tpu.memory_space<vmem>>, vector<1x1x256xf32>
      %26 = vector.shape_cast %25 : vector<1x1x256xf32> to vector<1x256xf32>
      %27 = vector.shape_cast %24 : vector<1x256xf32> to vector<1x1x256xf32>
      tpu.vector_store %arg3[%c0_22, %c1, %c0_23], %27 {strides = array<i32>} : memref<1x2x256xf32, #tpu.memory_space<vmem>>, vector<1x1x256xf32>,
    } else {
    }
    return
  }
  func.func @transform_0(%arg0: i32, %arg1: i32) -> (i32, i32, i32) {
    %c0_i32 = arith.constant 0 : i32
    %c0_i32_0 = arith.constant 0 : i32
    return %arg0, %arg1, %c0_i32 : i32, i32, i32
  }
  func.func @transform_1(%arg0: i32, %arg1: i32) -> (i32, i32, i32) {
    %c0_i32 = arith.constant 0 : i32
    %c0_i32_0 = arith.constant 0 : i32
    %c0_i32_1 = arith.constant 0 : i32
    return %arg0, %c0_i32, %c0_i32_0 : i32, i32, i32
  }
}

</mosaic_0001>

<bundles_post_ra>
// kernel: tpu_custom_call.1
= control target key start
LH: loop header
LB: loop body
LE: loop exit
PB: predicated region body
PF: predicated region fallthrough
CT: control target
= control target key end

     0   :  { %6 = vsyncpa [#allocation5], 0  ;;  %s745_s0 = inlined_call_operand.hbm [shape: f32[2,4,256], index: 0, kind: input, shape index: {}]   ;;  %s746_s1 = inlined_call_operand.hbm [shape: f32[2,2,256], index: 1, kind: output, shape index: {}]  }
   0x1   :  { %8 = vsyncpa [#allocation5 + $0x1], 0 }
   0x2   :  { %9 = vsyncpa [#allocation6], 0 }
   0x3   :  { %11 = vsyncpa [#allocation6 + $0x1], 0  ;;  %s556_s6 = smov 0   ;;  %s558_s7 = smov 0  }
   0x4   :  { %s560_s8 = smov 0   ;;  %s562_s9 = smov 0  }
   0x5   :  { %s564_s10 = smov 0   ;;  %s566_s11 = smov 0  }
   0x6 LB: > { %s343_s12 = sadd.s32 4294967295, %s539_s11   ;;  %s344_s13 = sadd.s32 4294967294, %s539_s11   ;;  %s539_s11 = sphi %s566_s11, %s17_s11   ;;  %s535_s10 = sphi %s564_s10, %s764_s10   ;;  %s531_s9 = sphi %s562_s9, %s763_s9   ;;  %s527_s8 = sphi %s560_s8, %s762_s8   ;;  %s523_s7 = sphi %s558_s7, %s761_s7   ;;  %s519_s6 = sphi %s556_s6, %s760_s6  }
   0x7   : > { %s29_s14 = sadd.s32 1, %s535_s10  ;;  %s38_s15 = sadd.s32 1, %s527_s8 }
   0x8   : > { %p31_p0 = scmp.ge.s32.totalorder %s29_s14, 2  ;;  %p45_p1 = scmp.ne.s32.totalorder %s527_s8, %s523_s7 }
   0x9   : > { %p46_p2 = scmp.eq.s32.totalorder %s539_s11, 0  ;;  %p51_p3 = scmp.ne.s32.totalorder %s523_s7, %s519_s6 }
   0xa   : > { %s766_s14 = smov (%p31_p0, %s29_s14), 0  ;;  %p52_p5 = scmp.eq.s32.totalorder %s343_s12, 0 }
   0xb   : > { %p597_p4 = por %p46_p2, %p45_p1  ;;  %s33_s17 = ssub.s32 %s535_s10, %s766_s14 }
   0xc   : > { %p75_p6 = scmp.eq.s32.totalorder %s343_s12, 1  ;;  %p36_p7 = scmp.eq.s32.totalorder %s33_s17, 0 }
   0xd   : > { %p603_p8 = por %p52_p5, %p51_p3  ;;  %p81_p10 = scmp.eq.s32.totalorder %s344_s13, 1 }
   0xe   : > { %p607_p9 = por %p75_p6, %p45_p1  ;;  %p373_p13 = scmp.lt.s32.totalorder %s539_s11, 2 }
   0xf   : > { %s612_s20 = scalar_select %p36_p7, %s527_s8, %s38_s15  }
  0x10   : > { %s750_s19 = scalar_select %p607_p9, 1, 0 }
  0x11   : > { %p614_p11 = por %p81_p10, %p51_p3  ;;  %s101_s22 = sand.u32 1, %s527_s8  }
  0x12   : > { %s347_s23 = sshll.u32 %s101_s22, 3  ;;  %s359_s24 = sshll.u32 %s535_s10, 7 }
  0x13   : > { %s751_s21 = scalar_select %p614_p11, 1, 0 }
  0x14   : > { %s625_s27 = scalar_lea.hbm %s745_s0, %s359_s24  ;;  %s105_s28 = scalar_lea.vmem [#allocation4], %s347_s23 }
  0x15   : > { %s115_s29 = sshll.u32 %s105_s28, 4  ;;  %p631_p0 = pnand %p373_p13, %p597_p4  ;;  %s627_s29 = int_to_ptr.vmem [resolvable:$true] %s115_s29 }
  0x16   : > { %s102_s2 = scalar_lea.sflag [#allocation5], %s101_s22  ;;  %s427_s3 = scalar_lea.hbm %s625_s27, 128 }
  0x17   : > { %p428_p3 = scmp.ne.s32.totalorder %s625_s27, %s427_s3  ;;  %p429_p5 = pneg %p631_p0 }
  0x18   : > { %s432_s12 = scalar_lea.hbm %s745_s0, 256  ;;  %p433_p4 = scmp.lt.u32.totalorder %s625_s27, %s745_s0 }
  0x19   : > { %p430_p6 = pnand %p429_p5, %p428_p3  ;;  %p434_p10 = scmp.lt.u32.totalorder %s432_s12, %s427_s3 }
  0x1a   : > { %p436_p12 = scmp.lt.u32.totalorder %s427_s3, %s625_s27 }
  0x1b   : > { %p431_p7 = pneg %p430_p6  ;;  %p435_p13 = por %p434_p10, %p433_p4 }
  0x1d   : > { %p437_p1 = por %p436_p12, %p435_p13 }
  0x1f   : > { %p438_p2 = pnand %p437_p1, %p431_p7 }
  0x21   : > { %441 = shalt.err (!%p438_p2)
}
  0x22   : > { %s442_s16 = scalar_lea.vmem %s627_s29, 128  ;;  %s541_s17 = smov [#allocation4]  }
  0x23   : > { %p443_p3 = scmp.ne.s32.totalorder %s627_s29, %s442_s16  ;;  %s447_s22 = sshll.u32 %s541_s17, 4  ;;  %s448_s22 = int_to_ptr.vmem [resolvable:$false] %s447_s22 }
  0x24   : > { %s449_s23 = scalar_lea.vmem %s448_s22, 256  ;;  %p450_p9 = scmp.lt.s32.totalorder %s627_s29, %s448_s22 }
  0x25   : > { %p445_p6 = pnand %p443_p3, %p429_p5  ;;  %p451_p4 = scmp.lt.s32.totalorder %s449_s23, %s442_s16 }
  0x27   : > { %p446_p11 = pneg %p445_p6  ;;  %p452_p10 = por %p451_p4, %p450_p9 }
  0x29   : > { %p453_p12 = pnand %p452_p10, %p446_p11 }
  0x2b   : > { %456 = shalt.err (!%p453_p12)
}
  0x2c   : > { %368 = dma.hbm_to_vmem [thread:$0]  (!%p631_p0), %s625_s27, 128, %s627_s29, %s102_s2  }
  0x2d   : > { %p753_p1 = scmp.lt.s32.totalorder %s539_s11, 3  ;;  %p754_p2 = scmp.ge.s32.totalorder %s539_s11, 1 }
  0x2f   : > { %p121_p5 = pnand %p754_p2, %p753_p1 }
  0x30   : > { %s667_s24 = sand.u32 (!%p121_p5), 1, %s523_s7  }
  0x31   : > { %124 = sbr.rel (%p121_p5) target bundleno = 105 (0x69), region = 24  ;;  %s351_s25 = sshll.u32 (!%p121_p5), %s667_s24, 3 }
  0x32   : > { %s127_s26 = scalar_lea.sflag (!%p121_p5), [#allocation5], %s667_s24  ;;  %s130_s28 = scalar_lea.vmem (!%p121_p5), [#allocation4], %s351_s25 }
  0x38   : > { %510 = dma.done.wait (%p603_p8), %s127_s26, 128  }
  0x39   : > { %512 = vsyncadd (%p603_p8), %s127_s26, 4294967168  ;;  %v153_v0 = vlaneseq  ;;  %v542_v2 = vmov 0.0   ;;  %v543_v3 = vmov -inf   ;;  %vm164_vm1 = vcmask 1043456   ;;  %v159_v4 = vld [vmem:[%s130_s28] sm:$0xff]  ;;  %s352_s18 = sshll.u32 %s667_s24, 2 }
  0x3a   : > { %v162_v5 = vcombine.high %v159_v4, %v159_v4  ;;  %v165_v6 = vsel %vm164_vm1, %v159_v4, 0.0  ;;  %v204_v7 = vsel %vm164_vm1, %v159_v4, -inf  ;;  %v544_v16 = vmov 1966171168   ;;  %s148_s27 = scalar_lea.vmem [#allocation7], %s352_s18  ;;  %s360_s30 = sshll.u32 %s531_s9, 6 }
  0x3b   : > { %vm675_vm0 = vcmp.lt.s32.totalorder %v153_v0, 256  ;;  %v166_v8 = vrot.slane %v165_v6, 4  ;;  %v205_v9 = vrot.slane %v204_v7, 4  ;;  %v183_v17 = vunpack.c.l.s4 %v544_v16  ;;  %s262_s29 = sshll.u32 %s148_s27, 4  ;;  %s696_s4 = scalar_lea.hbm %s746_s1, %s360_s30  ;;  %s689_s29 = int_to_ptr.vmem [resolvable:$true] %s262_s29 }
  0x3c   : > { %157 = vst.msk [vmem:[#allocation2] sm:$0x3] %vm675_vm0, %v542_v2  ;;  %158 = vst.msk [vmem:[#allocation3] sm:$0x3] %vm675_vm0, %v543_v3  ;;  %v172_v10 = vsel %vm164_vm1, %v162_v5, 0.0  ;;  %v211_v11 = vsel %vm164_vm1, %v162_v5, -inf }
  0x3d   : > { %v167_v12 = vadd.f32 %v166_v8, %v165_v6  ;;  %v173_v13 = vrot.slane %v172_v10, 4  ;;  %v206_v14 = vmax.f32 %v204_v7, %v205_v9  ;;  %v212_v15 = vrot.slane %v211_v11, 4  ;;  %s248_s9 = scalar_lea.sflag [#allocation6], %s667_s24  ;;  %s457_s5 = scalar_lea.vmem %s689_s29, 64 }
  0x3e   : > { %v184_v26 = vunpack.c.0.s8 %v183_v17  ;;  %v186_v27 = vshrl.u32 %v153_v0, 7  ;;  %p458_p8 = scmp.ne.s32.totalorder %s689_s29, %s457_s5  ;;  %p757_p9 = scmp.ne.s32.totalorder %s750_s19, 0 }
  0x3f   : > { %v168_v18 = vrot.slane %v167_v12, 2  ;;  %v174_v19 = vadd.f32 %v173_v13, %v172_v10  ;;  %v207_v20 = vrot.slane %v206_v14, 2  ;;  %v213_v21 = vmax.f32 %v211_v11, %v212_v15  ;;  %s545_s12 = smov [#allocation7]  }
  0x40   : > { %v187_v36 = vsub.s32 %v184_v26, %v186_v27  ;;  %p459_p11 = pnand %p458_p8, %p757_p9  ;;  %s461_s13 = sshll.u32 %s545_s12, 4  ;;  %s462_s13 = int_to_ptr.vmem [resolvable:$false] %s461_s13 }
  0x41   : > { %v169_v22 = vadd.f32 %v168_v18, %v167_v12  ;;  %v175_v23 = vrot.slane %v174_v19, 2  ;;  %v208_v24 = vmax.f32 %v206_v14, %v207_v20  ;;  %v214_v25 = vrot.slane %v213_v21, 2  ;;  %s463_s15 = scalar_lea.vmem %s462_s13, 128  ;;  %p464_p7 = scmp.lt.s32.totalorder %s689_s29, %s462_s13 }
  0x42   : > { %p460_p0 = pneg %p459_p11  ;;  %p465_p13 = scmp.lt.s32.totalorder %s463_s15, %s457_s5 }
  0x43   : > { %v170_v28 = vrot.slane %v169_v22, 1  ;;  %v176_v29 = vadd.f32 %v175_v23, %v174_v19  ;;  %v209_v30 = vrot.slane %v208_v24, 1  ;;  %v215_v31 = vmax.f32 %v213_v21, %v214_v25  ;;  %v160_v43 = vld [vmem:[#allocation2] sm:$0x3]  ;;  %v203_v44 = vld [vmem:[#allocation3] sm:$0x3] }
  0x44   : > { %p466_p3 = por %p465_p13, %p464_p7 }
  0x45   : > { %v171_v32 = vadd.f32 %v170_v28, %v169_v22  ;;  %v177_v33 = vrot.slane %v176_v29, 1  ;;  %v210_v34 = vmax.f32 %v208_v24, %v209_v30  ;;  %v216_v35 = vrot.slane %v215_v31, 1 }
  0x46   : > { %p467_p6 = pnand %p466_p3, %p460_p0 }
  0x47   : > { %v178_v37 = vadd.f32 %v177_v33, %v176_v29  ;;  %v217_v38 = vmax.f32 %v215_v31, %v216_v35 }
  0x49   : > { %v181_v39 = vcombine.low %v171_v32, %v178_v37  ;;  %v220_v40 = vcombine.low %v210_v34, %v217_v38 }
  0x4b   : > { %v188_v41 = vrot.slane %v181_v39, %v187_v36  ;;  %v227_v42 = vrot.slane %v220_v40, %v187_v36 }
  0x4d   : > { %v195_v45 = vrot.slane %v188_v41, %v187_v36  ;;  %v234_v46 = vrot.slane %v227_v42, %v187_v36 }
  0x4f   : > { %v197_v47 = vadd.f32 %v195_v45, %v160_v43  ;;  %v236_v48 = vmax.f32 %v203_v44, %v234_v46 }
  0x51   : > { %202 = vst.msk [vmem:[#allocation2] sm:$0x3] %vm675_vm0, %v197_v47  ;;  %237 = vst.msk [vmem:[#allocation3] sm:$0x3] %vm675_vm0, %v236_v48 }
  0x58   : > { %v241_v49 = vld [vmem:[#allocation2] sm:$0x3]  ;;  %v244_v50 = vld [vmem:[#allocation3] sm:$0x3] }
  0x59   : > { %v242_v51 = vmul.f32 0.25, %v241_v49  ;;  %353 = vst.msk [vmem:[%s148_s27 + $0x1] ss:$2 sm:$0x3] %vm675_vm0, %v244_v50 }
  0x5b   : > { %243 = vst.msk [vmem:[%s148_s27] ss:$2 sm:$0x3] %vm675_vm0, %v242_v51 }
  0x5c   : > { %470 = shalt.err (!%p467_p6)
}
  0x5d   : > { %s471_s16 = scalar_lea.hbm %s696_s4, 64  ;;  %s475_s23 = scalar_lea.hbm %s746_s1, 128 }
  0x5e   : > { %p472_p4 = scmp.ne.s32.totalorder %s696_s4, %s471_s16  ;;  %p476_p1 = scmp.lt.u32.totalorder %s696_s4, %s746_s1 }
  0x5f   : > { %p477_p2 = scmp.lt.u32.totalorder %s475_s23, %s471_s16  ;;  %p479_p8 = scmp.lt.u32.totalorder %s471_s16, %s696_s4 }
  0x60   : > { %p473_p10 = pnand %p472_p4, %p757_p9 }
  0x61   : > { %p478_p5 = por %p477_p2, %p476_p1 }
  0x62   : > { %p474_p12 = pneg %p473_p10 }
  0x63   : > { %p480_p11 = por %p479_p8, %p478_p5 }
  0x65   : > { %p481_p0 = pnand %p480_p11, %p474_p12 }
  0x67   : > { %484 = shalt.err (!%p481_p0)
}
  0x68   : > { %363 = dma.vmem_to_hbm [thread:$0]  (%p757_p9), %s689_s29, 64, %s696_s4, %s248_s9  }
  0x69 PF: > { %s274_s26 = sand.u32 1, %s519_s6   ;;  %p758_p7 = scmp.ne.s32.totalorder %s751_s21, 0 }
  0x6a   : > { %p759_p13 = scmp.ge.s32.totalorder %s539_s11, 2  ;;  %s275_s28 = scalar_lea.sflag [#allocation6], %s274_s26 }
  0x6c   : > { %p370_p3 = pnand %p759_p13, %p758_p7 }
  0x6e   : > { %514 = dma.done.wait (!%p370_p3), %s275_s28, 64  }
  0x6f   : > { %516 = vsyncadd (!%p370_p3), %s275_s28, 4294967232  ;;  %s17_s11 = sadd.s32 1, %s539_s11   ;;  %s760_s6 = smov %s523_s7 }
  0x70   : > { %p14_p6 = scmp.ge.s32.totalorder %s17_s11, 4   ;;  %s761_s7 = smov %s527_s8 }
  0x71   : > { %s762_s8 = smov %s612_s20  ;;  %s763_s9 = smov %s535_s10 }
  0x72   : > { %s764_s10 = smov %s766_s14  ;;  %16 = sbr.rel (!%p14_p6) target bundleno = 6 (0x6), region = 78 }
  0x79   :  { %280 = vsyncpa [#allocation5], 1 }
  0x7a   :  { %282 = vsyncpa [#allocation5 + $0x1], 1 }
  0x7b   :  { %283 = vsyncpa [#allocation6], 1 }
  0x7c   :  { %285 = vsyncpa [#allocation6 + $0x1], 1 }

</bundles_post_ra>
